<compile_context>
chip_gen: v6e
topology: v6e:2x2x1
jax: 0.10.0
libtpu: 0.0.40
codegen_flags: <defaults>
</compile_context>

<pallas_src>
import jax
import jax.numpy as jnp
from jax.experimental import pallas as pl
from jax.experimental.pallas import tpu as pltpu

BN_EPS = 1e-5

# Weights stored in this dtype at init (cast BEFORE pallas_call so HBM->VMEM
# traffic is already narrow).  Matmuls accumulate in f32.
WEIGHT_DTYPE = jnp.bfloat16


def _mm(a, w):
    """MXU matmul: both operands in the weight dtype, f32 accumulation."""
    return jnp.dot(a.astype(w.dtype), w, preferred_element_type=jnp.float32)


# ----------------------------- fused kernel ----------------------------------

def _resfc_kernel(rows_ref, y_ref, w1_ref, b1_ref, w2_ref, b2_ref,
                  rw_ref, rp_ref, wo_ref, bo_ref,
                  correct_ref, loss_ref, h_ref):
    t = pl.program_id(0)
    f32 = jnp.float32

    # ---- grid step 0: one-hot embed + input_fc_1 / input_fc_2 (+ReLU) -------
    @pl.when(t == 0)
    def _():
        rows = rows_ref[...]                       # (B, S) i32: flat one-hot col ids
        B, S = rows.shape
        d_in = w1_ref.shape[0]
        cols = jax.lax.broadcasted_iota(jnp.int32, (B, d_in), 1)
        x = jnp.zeros((B, d_in), f32)
        for s in range(S):                         # static, S is small
            x = x + (cols == rows[:, s:s + 1]).astype(f32)
        h1 = jnp.maximum(_mm(x, w1_ref[...]) + b1_ref[...], 0.0)
        h_ref[...] = jnp.maximum(_mm(h1, w2_ref[...]) + b2_ref[...], 0.0)

    # ---- residual layer t: Linear -> BatchNorm1d (batch stats) -> ReLU ------
    rw = rw_ref[0]                                 # (MID, MID) streamed per layer
    rp = rp_ref[0]                                 # (3, MID) f32: bias / gamma / beta
    bias, gamma, beta = rp[0:1, :], rp[1:2, :], rp[2:3, :]
    z = _mm(h_ref[...], rw) + bias
    mean = jnp.mean(z, axis=0, keepdims=True)
    var = jnp.mean(jnp.square(z - mean), axis=0, keepdims=True)  # two-pass: >= 0
    scale = gamma * jax.lax.rsqrt(var + BN_EPS)    # fold BN affine into one FMA
    h_ref[...] = jnp.maximum(z * scale + (beta - mean * scale), 0.0)

    # ---- last grid step: output fc fused with CrossEntropy + argmax ---------
    @pl.when(t == pl.num_programs(0) - 1)
    def _():
        logits = _mm(h_ref[...], wo_ref[...]) + bo_ref[...]   # (B, C) f32, VMEM only
        B, C = logits.shape
        y = y_ref[...]                                        # (B, 1) i32
        m = jnp.max(logits, axis=-1, keepdims=True)
        lse = m + jnp.log(jnp.sum(jnp.exp(logits - m), axis=-1, keepdims=True))
        cols = jax.lax.broadcasted_iota(jnp.int32, (B, C), 1)
        picked = jnp.sum(jnp.where(cols == y, logits, 0.0), axis=-1, keepdims=True)
        loss_ref[0] = jnp.sum(lse - picked) / B               # CrossEntropyLoss (mean)
        cand = jnp.where(logits == m, cols, C)                # first-occurrence argmax
        predict = jnp.min(cand, axis=-1, keepdims=True)
        correct_ref[0] = jnp.sum((predict == y).astype(jnp.int32))


# ----------------------------- wrapper ----------------------------------------

def res_fc_forward(params, x_tokens, y, *, input_bits, seqlen):
    V = 2 ** input_bits
    B, S = x_tokens.shape
    assert S == seqlen
    # Flattened one-hot column index of each token: s * V + token  (no one-hot
    # array is ever built outside the kernel).
    rows = x_tokens.astype(jnp.int32) + (jnp.arange(S, dtype=jnp.int32) * V)[None, :]
    y2 = y.reshape(-1, 1).astype(jnp.int32)

    w1, b1 = params["fc1"]
    w2, b2 = params["fc2"]
    wo, bo = params["out"]
    rw, rp = params["res_w"], params["res_p"]
    T, MID, _ = rw.shape
    D_in, HID = w1.shape
    C = wo.shape[1]

    inputs = (rows, y2, w1, b1, w2, b2, rw, rp, wo, bo)
    flops = 2 * B * (D_in * HID + HID * MID + T * MID * MID + MID * C)
    bytes_accessed = sum(int(a.size) * a.dtype.itemsize for a in inputs) + 8
    cost = pl.CostEstimate(flops=int(flops),
                           transcendentals=int(B * C + T * MID + B),
                           bytes_accessed=int(bytes_accessed))

    grid_spec = pltpu.PrefetchScalarGridSpec(
        num_scalar_prefetch=0,
        grid=(T,),                                    # one grid step per residual layer
        in_specs=[
            pl.BlockSpec((B, S), lambda t: (0, 0)),          # token column ids (i32)
            pl.BlockSpec((B, 1), lambda t: (0, 0)),          # labels
            pl.BlockSpec((D_in, HID), lambda t: (0, 0)),     # w1 (constant index -> resident)
            pl.BlockSpec((1, HID), lambda t: (0, 0)),        # b1
            pl.BlockSpec((HID, MID), lambda t: (0, 0)),      # w2
            pl.BlockSpec((1, MID), lambda t: (0, 0)),        # b2
            pl.BlockSpec((1, MID, MID), lambda t: (t, 0, 0)),  # residual weights: streamed, double-buffered
            pl.BlockSpec((1, 3, MID), lambda t: (t, 0, 0)),    # residual bias/gamma/beta
            pl.BlockSpec((MID, C), lambda t: (0, 0)),        # output fc weight
            pl.BlockSpec((1, C), lambda t: (0, 0)),          # output fc bias
        ],
        out_specs=(pl.BlockSpec(memory_space=pltpu.MemorySpace.SMEM),
                   pl.BlockSpec(memory_space=pltpu.MemorySpace.SMEM)),
        scratch_shapes=[pltpu.VMEM((B, MID), jnp.float32)],  # activation carried layer->layer
    )

    correct, loss = pl.pallas_call(
        _resfc_kernel,
        out_shape=(jax.ShapeDtypeStruct((1,), jnp.int32),
                   jax.ShapeDtypeStruct((1,), jnp.float32)),
        grid_spec=grid_spec,
        compiler_params=pltpu.CompilerParams(
            dimension_semantics=("arbitrary",),      # h carries across layers (sequential)
            vmem_limit_bytes=48 * 1024 * 1024),      # fits v7x's 64 MiB physical VMEM too
        cost_estimate=cost,
    )(*inputs)
    return correct[0], loss[0], None


# ----------------------------- params -----------------------------------------

def init_params(key, *, num_classes, input_bits, seqlen, hidden, middle, times=5):
    V = 2 ** input_bits

    def lin(k, fan_in, fan_out):
        k1, k2 = jax.random.split(k)
        bound = 1.0 / (fan_in ** 0.5)
        w = jax.random.uniform(k1, (fan_in, fan_out), jnp.float32, -bound, bound)
        b = jax.random.uniform(k2, (1, fan_out), jnp.float32, -bound, bound)
        return w.astype(WEIGHT_DTYPE), b             # weights bf16, biases f32

    keys = jax.random.split(key, 3 + times)
    res_w, res_p = [], []
    for i in range(times):
        w, b = lin(keys[2 + i], middle, middle)
        g = jnp.ones((1, middle), jnp.float32)       # BN weight init
        beta = jnp.zeros((1, middle), jnp.float32)   # BN bias init
        res_w.append(w)
        res_p.append(jnp.concatenate([b, g, beta], axis=0))   # (3, middle) f32
    return {
        "fc1": lin(keys[0], seqlen * V, hidden),
        "fc2": lin(keys[1], hidden, middle),
        "res_w": jnp.stack(res_w, axis=0),           # (times, middle, middle) bf16
        "res_p": jnp.stack(res_p, axis=0),           # (times, 3, middle) f32
        "out": lin(keys[2 + times], middle, num_classes),
    }


# ----------------------------- pure-JAX reference ------------------------------
# Mirrors the kernel's intended numerics (bf16 matmul operands, f32 accumulate,
# f32 BN/CE) so the comparison checks the Pallas implementation, not dtype drift.

def res_fc_reference(params, x_tokens, y, *, input_bits, seqlen):
    V = 2 ** input_bits
    B = x_tokens.shape[0]
    x = jax.nn.one_hot(x_tokens, V, dtype=jnp.float32).reshape(B, seqlen * V)
    x = jax.nn.relu(_mm(x, params["fc1"][0]) + params["fc1"][1])
    x = jax.nn.relu(_mm(x, params["fc2"][0]) + params["fc2"][1])
    for i in range(params["res_w"].shape[0]):
        w = params["res_w"][i]
        b = params["res_p"][i, 0:1, :]
        g = params["res_p"][i, 1:2, :]
        beta = params["res_p"][i, 2:3, :]
        z = _mm(x, w) + b
        mean = jnp.mean(z, axis=0, keepdims=True)
        var = jnp.mean((z - mean) ** 2, axis=0, keepdims=True)
        x = jax.nn.relu((z - mean) * jax.lax.rsqrt(var + BN_EPS) * g + beta)
    logits = _mm(x, params["out"][0]) + params["out"][1]
    lse = jax.scipy.special.logsumexp(logits, axis=-1)
    loss = jnp.mean(lse - logits[jnp.arange(B), y])
    correct = jnp.sum(jnp.argmax(logits, axis=-1) == y)
    return correct, loss, None


# ----------------------------- main --------------------------------------------

if __name__ == "__main__":
    NUM_CLASSES = 16
    INPUT_BITS = 4       # 2**4 = 16 one-hot classes per token
    SEQLEN = 8           # -> input dim 8 * 16 = 128
    HIDDEN = 128         # scaled-down stand-in for 1024
    MIDDLE = 256         # scaled-down stand-in for MIDDLE_SHAPE = 4096
    BATCH = 8

    key = jax.random.PRNGKey(0)
    kp, kx, ky = jax.random.split(key, 3)

    params = init_params(kp, num_classes=NUM_CLASSES, input_bits=INPUT_BITS,
                         seqlen=SEQLEN, hidden=HIDDEN, middle=MIDDLE, times=5)
    x_tokens = jax.random.randint(kx, (BATCH, SEQLEN), 0, 2 ** INPUT_BITS,
                                  dtype=jnp.int32)
    y = jax.random.randint(ky, (BATCH,), 0, NUM_CLASSES, dtype=jnp.int32)

    correct, loss, _ = res_fc_forward(params, x_tokens, y,
                                      input_bits=INPUT_BITS, seqlen=SEQLEN)
    jax.block_until_ready((correct, loss))

    c_ref, l_ref, _ = res_fc_reference(params, x_tokens, y,
                                       input_bits=INPUT_BITS, seqlen=SEQLEN)
    assert int(correct) == int(c_ref), (int(correct), int(c_ref))
    assert abs(float(loss) - float(l_ref)) < 2e-3, (float(loss), float(l_ref))

    print("KERNEL_OK")
</pallas_src>

<mosaic_0001>
module attributes {stable_mosaic.version = 11 : i64} {
  func.func @_resfc_kernel(%arg0: i32, %arg1: memref<8x8xi32, #tpu.memory_space<vmem>>, %arg2: memref<8x1xi32, #tpu.memory_space<vmem>>, %arg3: memref<128x128xbf16, #tpu.memory_space<vmem>>, %arg4: memref<1x128xf32, #tpu.memory_space<vmem>>, %arg5: memref<128x256xbf16, #tpu.memory_space<vmem>>, %arg6: memref<1x256xf32, #tpu.memory_space<vmem>>, %arg7: memref<1x256x256xbf16, #tpu.memory_space<vmem>>, %arg8: memref<1x3x256xf32, #tpu.memory_space<vmem>>, %arg9: memref<256x16xbf16, #tpu.memory_space<vmem>>, %arg10: memref<1x16xf32, #tpu.memory_space<vmem>>, %arg11: memref<1xi32, #tpu.memory_space<smem>>, %arg12: memref<1xf32, #tpu.memory_space<smem>>, %arg13: memref<8x256xf32, #tpu.memory_space<vmem>>) attributes {dimension_semantics = [#tpu.dimension_semantics<arbitrary>], iteration_bounds = array<i64: 5>, scalar_prefetch = 0 : i64, scratch_operands = 1 : i64, tpu.core_type = #tpu.core_type<tc>, window_params = [{pipeline_mode = #tpu.pipeline_mode<synchronous>, transform_indices = @transform_0, window_bounds = array<i64: 8, 8>}, {pipeline_mode = #tpu.pipeline_mode<synchronous>, transform_indices = @transform_1, window_bounds = array<i64: 8, 1>}, {pipeline_mode = #tpu.pipeline_mode<synchronous>, transform_indices = @transform_2, window_bounds = array<i64: 128, 128>}, {pipeline_mode = #tpu.pipeline_mode<synchronous>, transform_indices = @transform_3, window_bounds = array<i64: 1, 128>}, {pipeline_mode = #tpu.pipeline_mode<synchronous>, transform_indices = @transform_4, window_bounds = array<i64: 128, 256>}, {pipeline_mode = #tpu.pipeline_mode<synchronous>, transform_indices = @transform_5, window_bounds = array<i64: 1, 256>}, {transform_indices = @transform_6, window_bounds = array<i64: 1, 256, 256>}, {transform_indices = @transform_7, window_bounds = array<i64: 1, 3, 256>}, {pipeline_mode = #tpu.pipeline_mode<synchronous>, transform_indices = @transform_8, window_bounds = array<i64: 256, 16>}, {pipeline_mode = #tpu.pipeline_mode<synchronous>, transform_indices = @transform_9, window_bounds = array<i64: 1, 16>}, {transform_indices = @transform_10, window_bounds = array<i64: 1>}, {transform_indices = @transform_11, window_bounds = array<i64: 1>}]} {
    %c0_i32 = arith.constant 0 : i32
    %0 = arith.cmpi eq, %arg0, %c0_i32 : i32
    %1 = arith.extui %0 : i1 to i32
    %c0_i32_0 = arith.constant 0 : i32
    %2 = arith.cmpi ne, %1, %c0_i32_0 : i32
    scf.if %2 {
      %c0_17 = arith.constant 0 : index
      %c0_18 = arith.constant 0 : index
      %42 = vector.load %arg1[%c0_17, %c0_18] : memref<8x8xi32, #tpu.memory_space<vmem>>, vector<8x8xi32>
      %43 = tpu.iota {dimensions = array<i32: 1>} : vector<8x128xi32>
      %cst_19 = arith.constant 0.000000e+00 : f32
      %44 = vector.broadcast %cst_19 : f32 to vector<8x128xf32>
      %45 = vector.extract_strided_slice %42 {offsets = [0, 0], sizes = [8, 1], strides = [1, 1]} : vector<8x8xi32> to vector<8x1xi32>
      %46 = vector.broadcast %45 : vector<8x1xi32> to vector<8x128xi32>
      %47 = arith.cmpi eq, %43, %46 : vector<8x128xi32>
      %48 = arith.extui %47 : vector<8x128xi1> to vector<8x128xi32>
      %49 = arith.sitofp %48 : vector<8x128xi32> to vector<8x128xf32>
      %50 = arith.addf %44, %49 : vector<8x128xf32>
      %51 = vector.extract_strided_slice %42 {offsets = [0, 1], sizes = [8, 1], strides = [1, 1]} : vector<8x8xi32> to vector<8x1xi32>
      %52 = vector.broadcast %51 : vector<8x1xi32> to vector<8x128xi32>
      %53 = arith.cmpi eq, %43, %52 : vector<8x128xi32>
      %54 = arith.extui %53 : vector<8x128xi1> to vector<8x128xi32>
      %55 = arith.sitofp %54 : vector<8x128xi32> to vector<8x128xf32>
      %56 = arith.addf %50, %55 : vector<8x128xf32>
      %57 = vector.extract_strided_slice %42 {offsets = [0, 2], sizes = [8, 1], strides = [1, 1]} : vector<8x8xi32> to vector<8x1xi32>
      %58 = vector.broadcast %57 : vector<8x1xi32> to vector<8x128xi32>
      %59 = arith.cmpi eq, %43, %58 : vector<8x128xi32>
      %60 = arith.extui %59 : vector<8x128xi1> to vector<8x128xi32>
      %61 = arith.sitofp %60 : vector<8x128xi32> to vector<8x128xf32>
      %62 = arith.addf %56, %61 : vector<8x128xf32>
      %63 = vector.extract_strided_slice %42 {offsets = [0, 3], sizes = [8, 1], strides = [1, 1]} : vector<8x8xi32> to vector<8x1xi32>
      %64 = vector.broadcast %63 : vector<8x1xi32> to vector<8x128xi32>
      %65 = arith.cmpi eq, %43, %64 : vector<8x128xi32>
      %66 = arith.extui %65 : vector<8x128xi1> to vector<8x128xi32>
      %67 = arith.sitofp %66 : vector<8x128xi32> to vector<8x128xf32>
      %68 = arith.addf %62, %67 : vector<8x128xf32>
      %69 = vector.extract_strided_slice %42 {offsets = [0, 4], sizes = [8, 1], strides = [1, 1]} : vector<8x8xi32> to vector<8x1xi32>
      %70 = vector.broadcast %69 : vector<8x1xi32> to vector<8x128xi32>
      %71 = arith.cmpi eq, %43, %70 : vector<8x128xi32>
      %72 = arith.extui %71 : vector<8x128xi1> to vector<8x128xi32>
      %73 = arith.sitofp %72 : vector<8x128xi32> to vector<8x128xf32>
      %74 = arith.addf %68, %73 : vector<8x128xf32>
      %75 = vector.extract_strided_slice %42 {offsets = [0, 5], sizes = [8, 1], strides = [1, 1]} : vector<8x8xi32> to vector<8x1xi32>
      %76 = vector.broadcast %75 : vector<8x1xi32> to vector<8x128xi32>
      %77 = arith.cmpi eq, %43, %76 : vector<8x128xi32>
      %78 = arith.extui %77 : vector<8x128xi1> to vector<8x128xi32>
      %79 = arith.sitofp %78 : vector<8x128xi32> to vector<8x128xf32>
      %80 = arith.addf %74, %79 : vector<8x128xf32>
      %81 = vector.extract_strided_slice %42 {offsets = [0, 6], sizes = [8, 1], strides = [1, 1]} : vector<8x8xi32> to vector<8x1xi32>
      %82 = vector.broadcast %81 : vector<8x1xi32> to vector<8x128xi32>
      %83 = arith.cmpi eq, %43, %82 : vector<8x128xi32>
      %84 = arith.extui %83 : vector<8x128xi1> to vector<8x128xi32>
      %85 = arith.sitofp %84 : vector<8x128xi32> to vector<8x128xf32>
      %86 = arith.addf %80, %85 : vector<8x128xf32>
      %87 = vector.extract_strided_slice %42 {offsets = [0, 7], sizes = [8, 1], strides = [1, 1]} : vector<8x8xi32> to vector<8x1xi32>
      %88 = vector.broadcast %87 : vector<8x1xi32> to vector<8x128xi32>
      %89 = arith.cmpi eq, %43, %88 : vector<8x128xi32>
      %90 = arith.extui %89 : vector<8x128xi1> to vector<8x128xi32>
      %91 = arith.sitofp %90 : vector<8x128xi32> to vector<8x128xf32>
      %92 = arith.addf %86, %91 : vector<8x128xf32>
      %c0_20 = arith.constant 0 : index
      %c0_21 = arith.constant 0 : index
      %93 = vector.load %arg3[%c0_20, %c0_21] : memref<128x128xbf16, #tpu.memory_space<vmem>>, vector<128x128xbf16>
      %94 = arith.truncf %92 : vector<8x128xf32> to vector<8x128xbf16>
      %cst_22 = arith.constant dense<0.000000e+00> : vector<8x128xf32>
      %95 = tpu.matmul %94, %93, %cst_22 {dimension_numbers = #tpu.dot_dimension_numbers<[1], [0], [0], [1], [0, 0, 1, 1], [], []>} : vector<8x128xbf16>, vector<128x128xbf16>, vector<8x128xf32> -> vector<8x128xf32>
      %c0_23 = arith.constant 0 : index
      %c0_24 = arith.constant 0 : index
      %96 = vector.load %arg4[%c0_23, %c0_24] : memref<1x128xf32, #tpu.memory_space<vmem>>, vector<1x128xf32>
      %97 = vector.broadcast %96 : vector<1x128xf32> to vector<8x128xf32>
      %98 = arith.addf %95, %97 : vector<8x128xf32>
      %cst_25 = arith.constant 0.000000e+00 : f32
      %99 = vector.broadcast %cst_25 : f32 to vector<8x128xf32>
      %100 = arith.maximumf %98, %99 : vector<8x128xf32>
      %c0_26 = arith.constant 0 : index
      %c0_27 = arith.constant 0 : index
      %101 = vector.load %arg5[%c0_26, %c0_27] : memref<128x256xbf16, #tpu.memory_space<vmem>>, vector<128x256xbf16>
      %102 = arith.truncf %100 : vector<8x128xf32> to vector<8x128xbf16>
      %cst_28 = arith.constant dense<0.000000e+00> : vector<8x256xf32>
      %103 = tpu.matmul %102, %101, %cst_28 {dimension_numbers = #tpu.dot_dimension_numbers<[1], [0], [0], [1], [0, 0, 1, 1], [], []>} : vector<8x128xbf16>, vector<128x256xbf16>, vector<8x256xf32> -> vector<8x256xf32>
      %c0_29 = arith.constant 0 : index
      %c0_30 = arith.constant 0 : index
      %104 = vector.load %arg6[%c0_29, %c0_30] : memref<1x256xf32, #tpu.memory_space<vmem>>, vector<1x256xf32>
      %105 = vector.broadcast %104 : vector<1x256xf32> to vector<8x256xf32>
      %106 = arith.addf %103, %105 : vector<8x256xf32>
      %cst_31 = arith.constant 0.000000e+00 : f32
      %107 = vector.broadcast %cst_31 : f32 to vector<8x256xf32>
      %108 = arith.maximumf %106, %107 : vector<8x256xf32>
      %c0_32 = arith.constant 0 : index
      %c0_33 = arith.constant 0 : index
      %109 = vector.load %arg13[%c0_32, %c0_33] : memref<8x256xf32, #tpu.memory_space<vmem>>, vector<8x256xf32>
      tpu.vector_store %arg13[%c0_32, %c0_33], %108 {strides = array<i32>} : memref<8x256xf32, #tpu.memory_space<vmem>>, vector<8x256xf32>,
    } else {
    }
    %c0 = arith.constant 0 : index
    %c0_1 = arith.constant 0 : index
    %c0_2 = arith.constant 0 : index
    %3 = vector.load %arg7[%c0, %c0_1, %c0_2] : memref<1x256x256xbf16, #tpu.memory_space<vmem>>, vector<1x256x256xbf16>
    %4 = vector.shape_cast %3 : vector<1x256x256xbf16> to vector<256x256xbf16>
    %c0_3 = arith.constant 0 : index
    %c0_4 = arith.constant 0 : index
    %c0_5 = arith.constant 0 : index
    %5 = vector.load %arg8[%c0_3, %c0_4, %c0_5] : memref<1x3x256xf32, #tpu.memory_space<vmem>>, vector<1x3x256xf32>
    %6 = vector.shape_cast %5 : vector<1x3x256xf32> to vector<3x256xf32>
    %7 = vector.extract_strided_slice %6 {offsets = [0, 0], sizes = [1, 256], strides = [1, 1]} : vector<3x256xf32> to vector<1x256xf32>
    %8 = vector.extract_strided_slice %6 {offsets = [1, 0], sizes = [1, 256], strides = [1, 1]} : vector<3x256xf32> to vector<1x256xf32>
    %9 = vector.extract_strided_slice %6 {offsets = [2, 0], sizes = [1, 256], strides = [1, 1]} : vector<3x256xf32> to vector<1x256xf32>
    %c0_6 = arith.constant 0 : index
    %c0_7 = arith.constant 0 : index
    %10 = vector.load %arg13[%c0_6, %c0_7] : memref<8x256xf32, #tpu.memory_space<vmem>>, vector<8x256xf32>
    %11 = arith.truncf %10 : vector<8x256xf32> to vector<8x256xbf16>
    %cst = arith.constant dense<0.000000e+00> : vector<8x256xf32>
    %12 = tpu.matmul %11, %4, %cst {dimension_numbers = #tpu.dot_dimension_numbers<[1], [0], [0], [1], [0, 0, 1, 1], [], []>} : vector<8x256xbf16>, vector<256x256xbf16>, vector<8x256xf32> -> vector<8x256xf32>
    %13 = vector.broadcast %7 : vector<1x256xf32> to vector<8x256xf32>
    %14 = arith.addf %12, %13 : vector<8x256xf32>
    %cst_8 = arith.constant dense<0.000000e+00> : vector<256xf32>
    %15 = vector.multi_reduction <add>, %14, %cst_8 [0] : vector<8x256xf32> to vector<256xf32>
    %16 = vector.shape_cast %15 : vector<256xf32> to vector<1x256xf32>
    %cst_9 = arith.constant 8.000000e+00 : f32
    %17 = vector.broadcast %cst_9 : f32 to vector<1x256xf32>
    %18 = arith.divf %16, %17 : vector<1x256xf32>
    %19 = vector.broadcast %18 : vector<1x256xf32> to vector<8x256xf32>
    %20 = arith.subf %14, %19 : vector<8x256xf32>
    %21 = arith.mulf %20, %20 : vector<8x256xf32>
    %cst_10 = arith.constant dense<0.000000e+00> : vector<256xf32>
    %22 = vector.multi_reduction <add>, %21, %cst_10 [0] : vector<8x256xf32> to vector<256xf32>
    %23 = vector.shape_cast %22 : vector<256xf32> to vector<1x256xf32>
    %cst_11 = arith.constant 8.000000e+00 : f32
    %24 = vector.broadcast %cst_11 : f32 to vector<1x256xf32>
    %25 = arith.divf %23, %24 : vector<1x256xf32>
    %cst_12 = arith.constant 9.99999974E-6 : f32
    %26 = vector.broadcast %cst_12 : f32 to vector<1x256xf32>
    %27 = arith.addf %25, %26 : vector<1x256xf32>
    %28 = math.rsqrt %27 : vector<1x256xf32>
    %29 = arith.mulf %8, %28 : vector<1x256xf32>
    %30 = vector.broadcast %29 : vector<1x256xf32> to vector<8x256xf32>
    %31 = arith.mulf %14, %30 : vector<8x256xf32>
    %32 = arith.mulf %18, %29 : vector<1x256xf32>
    %33 = arith.subf %9, %32 : vector<1x256xf32>
    %34 = vector.broadcast %33 : vector<1x256xf32> to vector<8x256xf32>
    %35 = arith.addf %31, %34 : vector<8x256xf32>
    %cst_13 = arith.constant 0.000000e+00 : f32
    %36 = vector.broadcast %cst_13 : f32 to vector<8x256xf32>
    %37 = arith.maximumf %35, %36 : vector<8x256xf32>
    %c0_14 = arith.constant 0 : index
    %c0_15 = arith.constant 0 : index
    %38 = vector.load %arg13[%c0_14, %c0_15] : memref<8x256xf32, #tpu.memory_space<vmem>>, vector<8x256xf32>
    tpu.vector_store %arg13[%c0_14, %c0_15], %37 {strides = array<i32>} : memref<8x256xf32, #tpu.memory_space<vmem>>, vector<8x256xf32>,
    %c4_i32 = arith.constant 4 : i32
    %39 = arith.cmpi eq, %arg0, %c4_i32 : i32
    %40 = arith.extui %39 : i1 to i32
    %c0_i32_16 = arith.constant 0 : i32
    %41 = arith.cmpi ne, %40, %c0_i32_16 : i32
    scf.if %41 {
      %c0_17 = arith.constant 0 : index
      %c0_18 = arith.constant 0 : index
      %42 = vector.load %arg13[%c0_17, %c0_18] : memref<8x256xf32, #tpu.memory_space<vmem>>, vector<8x256xf32>
      %c0_19 = arith.constant 0 : index
      %c0_20 = arith.constant 0 : index
      %43 = vector.load %arg9[%c0_19, %c0_20] : memref<256x16xbf16, #tpu.memory_space<vmem>>, vector<256x16xbf16>
      %44 = arith.truncf %42 : vector<8x256xf32> to vector<8x256xbf16>
      %cst_21 = arith.constant dense<0.000000e+00> : vector<8x16xf32>
      %45 = tpu.matmul %44, %43, %cst_21 {dimension_numbers = #tpu.dot_dimension_numbers<[1], [0], [0], [1], [0, 0, 1, 1], [], []>} : vector<8x256xbf16>, vector<256x16xbf16>, vector<8x16xf32> -> vector<8x16xf32>
      %c0_22 = arith.constant 0 : index
      %c0_23 = arith.constant 0 : index
      %46 = vector.load %arg10[%c0_22, %c0_23] : memref<1x16xf32, #tpu.memory_space<vmem>>, vector<1x16xf32>
      %47 = vector.broadcast %46 : vector<1x16xf32> to vector<8x16xf32>
      %48 = arith.addf %45, %47 : vector<8x16xf32>
      %c0_24 = arith.constant 0 : index
      %c0_25 = arith.constant 0 : index
      %49 = vector.load %arg2[%c0_24, %c0_25] : memref<8x1xi32, #tpu.memory_space<vmem>>, vector<8x1xi32>
      %cst_26 = arith.constant dense<0xFF800000> : vector<8xf32>
      %50 = vector.multi_reduction <maximumf>, %48, %cst_26 [1] : vector<8x16xf32> to vector<8xf32>
      %51 = vector.shape_cast %50 : vector<8xf32> to vector<8x1xf32>
      %52 = vector.broadcast %51 : vector<8x1xf32> to vector<8x16xf32>
      %53 = arith.subf %48, %52 : vector<8x16xf32>
      %54 = math.exp %53 : vector<8x16xf32>
      %cst_27 = arith.constant dense<0.000000e+00> : vector<8xf32>
      %55 = vector.multi_reduction <add>, %54, %cst_27 [1] : vector<8x16xf32> to vector<8xf32>
      %56 = vector.shape_cast %55 : vector<8xf32> to vector<8x1xf32>
      %57 = math.log %56 : vector<8x1xf32>
      %58 = arith.addf %51, %57 : vector<8x1xf32>
      %59 = tpu.iota {dimensions = array<i32: 1>} : vector<8x16xi32>
      %60 = vector.broadcast %49 : vector<8x1xi32> to vector<8x16xi32>
      %61 = arith.cmpi eq, %59, %60 : vector<8x16xi32>
      %cst_28 = arith.constant 0.000000e+00 : f32
      %62 = vector.broadcast %cst_28 : f32 to vector<8x16xf32>
      %63 = arith.select %61, %48, %62 : vector<8x16xi1>, vector<8x16xf32>
      %cst_29 = arith.constant dense<0.000000e+00> : vector<8xf32>
      %64 = vector.multi_reduction <add>, %63, %cst_29 [1] : vector<8x16xf32> to vector<8xf32>
      %65 = vector.shape_cast %64 : vector<8xf32> to vector<8x1xf32>
      %66 = arith.subf %58, %65 : vector<8x1xf32>
      %67 = vector.shape_cast %66 : vector<8x1xf32> to vector<1x8x1xf32>
      %cst_30 = arith.constant dense<0.000000e+00> : vector<1xf32>
      %68 = vector.multi_reduction <add>, %67, %cst_30 [1, 2] : vector<1x8x1xf32> to vector<1xf32>
      %69 = vector.shape_cast %68 : vector<1xf32> to vector<1x1x1xf32>
      %70 = vector.extract %69[0, 0, 0] : f32 from vector<1x1x1xf32>
      %cst_31 = arith.constant 8.000000e+00 : f32
      %71 = arith.divf %70, %cst_31 : f32
      %c0_32 = arith.constant 0 : index
      %72 = memref.load %arg12[%c0_32] : memref<1xf32, #tpu.memory_space<smem>>
      memref.store %71, %arg12[%c0_32] : memref<1xf32, #tpu.memory_space<smem>>
      %73 = vector.broadcast %51 : vector<8x1xf32> to vector<8x16xf32>
      %74 = arith.cmpf oeq, %48, %73 : vector<8x16xf32>
      %c16_i32 = arith.constant 16 : i32
      %75 = vector.broadcast %c16_i32 : i32 to vector<8x16xi32>
      %76 = arith.select %74, %59, %75 : vector<8x16xi1>, vector<8x16xi32>
      %cst_33 = arith.constant dense<2147483647> : vector<8xi32>
      %77 = vector.multi_reduction <minsi>, %76, %cst_33 [1] : vector<8x16xi32> to vector<8xi32>
      %78 = vector.shape_cast %77 : vector<8xi32> to vector<8x1xi32>
      %79 = arith.cmpi eq, %78, %49 : vector<8x1xi32>
      %80 = arith.extui %79 : vector<8x1xi1> to vector<8x1xi32>
      %81 = vector.shape_cast %80 : vector<8x1xi32> to vector<1x8x1xi32>
      %cst_34 = arith.constant dense<0> : vector<1xi32>
      %82 = vector.multi_reduction <add>, %81, %cst_34 [1, 2] : vector<1x8x1xi32> to vector<1xi32>
      %83 = vector.shape_cast %82 : vector<1xi32> to vector<1x1x1xi32>
      %84 = vector.extract %83[0, 0, 0] : i32 from vector<1x1x1xi32>
      %c0_35 = arith.constant 0 : index
      %85 = memref.load %arg11[%c0_35] : memref<1xi32, #tpu.memory_space<smem>>
      memref.store %84, %arg11[%c0_35] : memref<1xi32, #tpu.memory_space<smem>>
    } else {
    }
    return
  }
  func.func @transform_0(%arg0: i32) -> (i32, i32) {
    %c0_i32 = arith.constant 0 : i32
    %c0_i32_0 = arith.constant 0 : i32
    %c0_i32_1 = arith.constant 0 : i32
    return %c0_i32, %c0_i32_0 : i32, i32
  }
  func.func @transform_1(%arg0: i32) -> (i32, i32) {
    %c0_i32 = arith.constant 0 : i32
    %c0_i32_0 = arith.constant 0 : i32
    %c0_i32_1 = arith.constant 0 : i32
    return %c0_i32, %c0_i32_0 : i32, i32
  }
  func.func @transform_2(%arg0: i32) -> (i32, i32) {
    %c0_i32 = arith.constant 0 : i32
    %c0_i32_0 = arith.constant 0 : i32
    %c0_i32_1 = arith.constant 0 : i32
    return %c0_i32, %c0_i32_0 : i32, i32
  }
  func.func @transform_3(%arg0: i32) -> (i32, i32) {
    %c0_i32 = arith.constant 0 : i32
    %c0_i32_0 = arith.constant 0 : i32
    %c0_i32_1 = arith.constant 0 : i32
    return %c0_i32, %c0_i32_0 : i32, i32
  }
  func.func @transform_4(%arg0: i32) -> (i32, i32) {
    %c0_i32 = arith.constant 0 : i32
    %c0_i32_0 = arith.constant 0 : i32
    %c0_i32_1 = arith.constant 0 : i32
    return %c0_i32, %c0_i32_0 : i32, i32
  }
  func.func @transform_5(%arg0: i32) -> (i32, i32) {
    %c0_i32 = arith.constant 0 : i32
    %c0_i32_0 = arith.constant 0 : i32
    %c0_i32_1 = arith.constant 0 : i32
    return %c0_i32, %c0_i32_0 : i32, i32
  }
  func.func @transform_6(%arg0: i32) -> (i32, i32, i32) {
    %c0_i32 = arith.constant 0 : i32
    %c0_i32_0 = arith.constant 0 : i32
    %c0_i32_1 = arith.constant 0 : i32
    return %arg0, %c0_i32, %c0_i32_0 : i32, i32, i32
  }
  func.func @transform_7(%arg0: i32) -> (i32, i32, i32) {
    %c0_i32 = arith.constant 0 : i32
    %c0_i32_0 = arith.constant 0 : i32
    %c0_i32_1 = arith.constant 0 : i32
    return %arg0, %c0_i32, %c0_i32_0 : i32, i32, i32
  }
  func.func @transform_8(%arg0: i32) -> (i32, i32) {
    %c0_i32 = arith.constant 0 : i32
    %c0_i32_0 = arith.constant 0 : i32
    %c0_i32_1 = arith.constant 0 : i32
    return %c0_i32, %c0_i32_0 : i32, i32
  }
  func.func @transform_9(%arg0: i32) -> (i32, i32) {
    %c0_i32 = arith.constant 0 : i32
    %c0_i32_0 = arith.constant 0 : i32
    %c0_i32_1 = arith.constant 0 : i32
    return %c0_i32, %c0_i32_0 : i32, i32
  }
  func.func @transform_10(%arg0: i32) -> i32 {
    %c0_i32 = arith.constant 0 : i32
    %c0_i32_0 = arith.constant 0 : i32
    return %c0_i32 : i32
  }
  func.func @transform_11(%arg0: i32) -> i32 {
    %c0_i32 = arith.constant 0 : i32
    %c0_i32_0 = arith.constant 0 : i32
    return %c0_i32 : i32
  }
}

</mosaic_0001>

<bundles_post_ra>
// kernel: tpu_custom_call.1
= control target key start
LH: loop header
LB: loop body
LE: loop exit
PB: predicated region body
PF: predicated region fallthrough
CT: control target
= control target key end

     0   :  { %s2462_s0 = inlined_call_operand.vmem [shape: s32[8,8], index: 0, kind: input, shape index: {}]   ;;  %s2463_s1 = inlined_call_operand.vmem [shape: s32[8,1], index: 1, kind: input, shape index: {}]   ;;  %s2464_s2 = inlined_call_operand.hbm [shape: bf16[128,128], index: 2, kind: input, shape index: {}]   ;;  %s2465_s3 = inlined_call_operand.vmem [shape: f32[1,128], index: 3, kind: input, shape index: {}]   ;;  %s2466_s4 = inlined_call_operand.vmem [shape: bf16[128,256], index: 4, kind: input, shape index: {}]   ;;  %s2467_s5 = inlined_call_operand.vmem [shape: f32[1,256], index: 5, kind: input, shape index: {}]   ;;  %s2468_s6 = inlined_call_operand.hbm [shape: bf16[5,256,256], index: 6, kind: input, shape index: {}]   ;;  %s2469_s7 = inlined_call_operand.hbm [shape: f32[5,3,256], index: 7, kind: input, shape index: {}]   ;;  %s2470_s8 = inlined_call_operand.vmem [shape: bf16[256,16], index: 8, kind: input, shape index: {}]   ;;  %s2471_s9 = inlined_call_operand.vmem [shape: f32[1,16], index: 9, kind: input, shape index: {}]   ;;  %s2472_s10 = inlined_call_operand.hbm [shape: s32[1], index: 10, kind: output, shape index: {0}]   ;;  %s2473_s11 = inlined_call_operand.hbm [shape: f32[1], index: 11, kind: output, shape index: {1}]  }
   0x1   :  { %2479 = sst [smem:[#allocation19_spill]] %s2468_s6 }
   0x2   :  { %17 = vsyncpa [#allocation4], 0 }
   0x3   :  { %18 = vsyncpa [#allocation7], 0 }
   0x4   :  { %20 = vsyncpa [#allocation7 + $0x1], 0 }
   0x5   :  { %21 = vsyncpa [#allocation5], 0 }
   0x6   :  { %22 = vsyncpa [#allocation11], 0  ;;  %s2090_s17 = smov 0   ;;  %s2092_s18 = smov 0  }
   0x7   :  { %s2094_s19 = smov 0   ;;  %s2096_s20 = smov 0  }
   0x8 LB: > { %2480 = sst [smem:[#allocation16_spill]] %s2004_s19  ;;  %s2111_s21 = sadd.s32 1, %s2008_s20   ;;  %s2008_s20 = sphi %s2096_s20, %s2492_s20   ;;  %s2004_s19 = sphi %s2094_s19, %s2494_s19   ;;  %s2000_s18 = sphi %s2092_s18, %s2496_s18   ;;  %s1996_s17 = sphi %s2090_s17, %s2495_s17  }
   0x9   : > { %2481 = sst [smem:[#allocation17_spill]] %s2111_s21  ;;  %s161_s22 = sadd.s32 1, %s2004_s19 }
   0xa   : > { %s158_s23 = ssub.s32 %s2008_s20, %s2111_s21  ;;  %p168_p0 = scmp.ne.s32.totalorder %s2004_s19, %s2000_s18 }
   0xb   : > { %p159_p1 = scmp.eq.s32.totalorder %s158_s23, 0  ;;  %p169_p2 = scmp.eq.s32.totalorder %s2008_s20, 0 }
   0xc   : > { %p1689_p3 = scmp.lt.s32.totalorder %s2008_s20, 5  ;;  %s342_s25 = sand.u32 1, %s2008_s20  }
   0xd   : > { %s2121_s24 = scalar_select %p159_p1, %s2004_s19, %s161_s22  }
   0xe   : > { %p170_p4 = por %p169_p2, %p168_p0  ;;  %s344_s26 = sand.u32 1, %s2004_s19  }
   0xf   : > { %2482 = sst [smem:[#allocation18_spill]] %s2121_s24  ;;  %s1504_s27 = sshll.u32 %s344_s26, 8 }
  0x10   : > { %s1604_s28 = sshll.u32 %s2008_s20, 12  ;;  %s2483_s6 = sld [smem:[#allocation19_spill]] }
  0x11   : > { %s346_s13 = scalar_lea.vmem [#allocation6], %s1504_s27  ;;  %p2133_p5 = pnand %p1689_p3, %p170_p4 }
  0x12   : > { %s353_s14 = sshll.u32 %s346_s13, 4  ;;  %s2139_s16 = scalar_lea.sflag [#allocation7], %s342_s25  ;;  %s2137_s14 = int_to_ptr.vmem [resolvable:$true] %s353_s14 }
  0x13   : > { %p1862_p7 = pneg %p2133_p5 }
  0x16   : > { %s2131_s12 = scalar_lea.hbm %s2483_s6, %s1604_s28  ;;  %s1865_s28 = scalar_lea.hbm %s2483_s6, 20480 }
  0x17   : > { %s1860_s22 = scalar_lea.hbm %s2131_s12, 4096  ;;  %p1866_p10 = scmp.lt.s32.totalorder %s2131_s12, %s2483_s6 }
  0x18   : > { %p1861_p6 = scmp.ne.s32.totalorder %s2131_s12, %s1860_s22  ;;  %p1867_p11 = scmp.lt.s32.totalorder %s1865_s28, %s1860_s22 }
  0x1a   : > { %p1863_p8 = pnand %p1862_p7, %p1861_p6  ;;  %p1868_p12 = por %p1867_p11, %p1866_p10 }
  0x1c   : > { %p1864_p9 = pneg %p1863_p8 }
  0x1e   : > { %p1869_p13 = pnand %p1868_p12, %p1864_p9 }
  0x20   : > { %1872 = shalt.err (!%p1869_p13)
}
  0x21   : > { %s1873_s25 = scalar_lea.vmem %s2137_s14, 4096  ;;  %s2010_s13 = smov [#allocation6]  }
  0x22   : > { %p1874_p0 = scmp.ne.s32.totalorder %s2137_s14, %s1873_s25  ;;  %s1878_s23 = sshll.u32 %s2010_s13, 4  ;;  %s1879_s23 = int_to_ptr.vmem [resolvable:$false] %s1878_s23 }
  0x23   : > { %s1880_s27 = scalar_lea.vmem %s1879_s23, 8192  ;;  %p1881_p3 = scmp.lt.s32.totalorder %s2137_s14, %s1879_s23 }
  0x24   : > { %p1876_p1 = pnand %p1874_p0, %p1862_p7  ;;  %p1882_p4 = scmp.lt.s32.totalorder %s1880_s27, %s1873_s25 }
  0x26   : > { %p1877_p2 = pneg %p1876_p1  ;;  %p1883_p6 = por %p1882_p4, %p1881_p3 }
  0x28   : > { %p1884_p8 = pnand %p1883_p6, %p1877_p2 }
  0x2a   : > { %1887 = shalt.err (!%p1884_p8)
}
  0x2b   : > { %s2011_s22 = smov 128   ;;  %s2012_s28 = smov 8  }
  0x2c   : > { %1684 = dma.hbm_to_vmem [thread:$0]  (!%p2133_p5), %s2131_s12, 4096, %s2137_s14, %s2139_s16, %s2011_s22, %s2011_s22, %s2012_s28  }
  0x2d   : > { %s2167_s29 = sadd.s32 4294967295, %s2008_s20   ;;  %p174_p10 = scmp.ne.s32.totalorder %s2000_s18, %s1996_s17 }
  0x2e   : > { %p2477_p9 = scmp.eq.s32.totalorder %s2167_s29, 0  ;;  %p1501_p11 = scmp.ge.s32.totalorder %s2008_s20, 1 }
  0x2f   : > { %p295_p12 = scmp.lt.s32.totalorder %s2008_s20, 6  ;;  %s2013_s12 = smov [#allocation3]  }
  0x30   : > { %p2177_p0 = por %p2477_p9, %p174_p10  ;;  %s313_s14 = sshll.u32 %s2013_s12, 4  ;;  %s314_s14 = int_to_ptr.vmem [resolvable:$true] %s313_s14 }
  0x31   : > { %p2181_p1 = pnand %p1501_p11, %p295_p12  ;;  %s1507_s17 = sshll.u32 %s344_s26, 3 }
  0x32   : > { %s2485_s30 = scalar_select %p2177_p0, 1, 0 }
  0x33   : > { %p1677_p2 = pneg %p2181_p1  ;;  %s1605_s13 = sshll.u32 %s2008_s20, 7 }
  0x34   : > { %s2199_s28 = scalar_lea.hbm %s2469_s7, %s1605_s13  ;;  %s367_s6 = scalar_lea.vmem [#allocation8], %s1507_s17 }
  0x35   : > { %p2192_p3 = pnand %p1677_p2, %p2477_p9  ;;  %s375_s24 = sshll.u32 %s367_s6, 4  ;;  %s2201_s24 = int_to_ptr.vmem [resolvable:$true] %s375_s24 }
  0x36   : > { %s1899_s12 = scalar_lea.vmem %s314_s14, 1024  ;;  %p1907_p11 = scmp.lt.s32.totalorder %s314_s14, %s314_s14 }
  0x37   : > { %p1890_p4 = pneg %p2192_p3  ;;  %p1900_p6 = scmp.ne.s32.totalorder %s314_s14, %s1899_s12 }
  0x38   : > { %p1908_p12 = scmp.lt.s32.totalorder %s1899_s12, %s1899_s12 }
  0x39   : > { %p1902_p8 = pnand %p1900_p6, %p1890_p4 }
  0x3a   : > { %p1909_p2 = por %p1908_p12, %p1907_p11 }
  0x3b   : > { %p1903_p10 = pneg %p1902_p8 }
  0x3d   : > { %p1910_p13 = pnand %p1909_p2, %p1903_p10 }
  0x3f   : > { %1913 = shalt.err (!%p1910_p13)
}
  0x40   : > { %s2014_s20 = smov 64   ;;  %s2015_s6 = smov 4  }
  0x41   : > { %1680 = dma.hbm_to_vmem [thread:$0]  (!%p2192_p3), %s2464_s2, 1024, %s314_s14, [#allocation4], %s2014_s20, %s2014_s20, %s2015_s6  }
  0x42   : > { %s1914_s13 = scalar_lea.hbm %s2199_s28, 128  ;;  %s1919_s12 = scalar_lea.hbm %s2469_s7, 640 }
  0x43   : > { %p1915_p4 = scmp.ne.s32.totalorder %s2199_s28, %s1914_s13  ;;  %p1920_p13 = scmp.lt.s32.totalorder %s2199_s28, %s2469_s7 }
  0x44   : > { %p1921_p10 = scmp.lt.s32.totalorder %s1919_s12, %s1914_s13 }
  0x45   : > { %p1917_p6 = pnand %p1915_p4, %p1862_p7 }
  0x46   : > { %p1922_p11 = por %p1921_p10, %p1920_p13 }
  0x47   : > { %p1918_p8 = pneg %p1917_p6 }
  0x49   : > { %p1923_p12 = pnand %p1922_p11, %p1918_p8 }
  0x4b   : > { %1926 = shalt.err (!%p1923_p12)
}
  0x4c   : > { %s1927_s14 = scalar_lea.vmem %s2201_s24, 128  ;;  %s2016_s23 = smov [#allocation8]  }
  0x4d   : > { %p1928_p3 = scmp.ne.s32.totalorder %s2201_s24, %s1927_s14  ;;  %s1932_s20 = sshll.u32 %s2016_s23, 4  ;;  %s1933_s20 = int_to_ptr.vmem [resolvable:$false] %s1932_s20 }
  0x4e   : > { %s1934_s6 = scalar_lea.vmem %s1933_s20, 256  ;;  %p1935_p6 = scmp.lt.s32.totalorder %s2201_s24, %s1933_s20 }
  0x4f   : > { %p1930_p2 = pnand %p1928_p3, %p1862_p7  ;;  %p1936_p9 = scmp.lt.s32.totalorder %s1934_s6, %s1927_s14 }
  0x51   : > { %p1931_p4 = pneg %p1930_p2  ;;  %p1937_p0 = por %p1936_p9, %p1935_p6 }
  0x53   : > { %p1938_p13 = pnand %p1937_p0, %p1931_p4 }
  0x55   : > { %1941 = shalt.err (!%p1938_p13)
}
  0x56   : > { %1687 = dma.hbm_to_vmem [thread:$0]  (!%p2133_p5), %s2199_s28, 128, %s2201_s24, %s2139_s16  }
  0x57   : > { %384 = sbr.rel (%p2181_p1) target bundleno = 1879 (0x757), region = 60  ;;  %p2488_p7 = scmp.eq.s32.totalorder (!%p2181_p1), %s2167_s29, 0 }
  0x5c   : > { %1979 = dma.done.wait (%p2488_p7), [#allocation4], 1024   ;;  %p2489_p8 = pmov %p2488_p7 }
  0x5d   : > { %s390_s19 = sand.u32 1, %s2167_s29   ;;  %s392_s21 = sand.u32 1, %s2000_s18  }
  0x5e   : > { %1981 = vsyncadd (%p2489_p8), [#allocation4], 4294966272  ;;  %s1512_s26 = sshll.u32 %s392_s21, 8  ;;  %s391_s15 = scalar_lea.sflag [#allocation7], %s390_s19 }
  0x5f   : > { %s2241_s17 = scalar_lea.vmem [#allocation6], %s1512_s26  ;;  %p2490_p9 = scmp.ne.s32.totalorder %s2485_s30, 0 }
  0x61   : > { %1983 = dma.done.wait (%p2490_p9), %s391_s15, 4224  }
  0x62   : > { %1985 = vsyncadd (%p2490_p9), %s391_s15, 4294963072  ;;  %s2247_s24 = sshll.u32 %s392_s21, 3  ;;  %p2491_p5 = scmp.ne.s32.totalorder %s2167_s29, 0 }
  0x63   : > { %s403_s16 = scalar_lea.vmem [#allocation8], %s2247_s24 }
  0x64   : > { %446 = sbr.rel (%p2491_p5) target bundleno = 656 (0x290), region = 76 }
  0x69   : > { %v447_v0 = vld [vmem:[%s2462_s0] sm:$0xff]  ;;  %v1754_v1 = vld [vmem:[#allocation3 + $0x38] sm:$0xff]   ;;  %v2017_v2 = vmov 2   ;;  %v2018_v3 = vmov 0   ;;  %v2019_v4 = vmov 0.0   ;;  %v2020_v6 = vmov 3  }
  0x6a   : > { %1747 = vset.pattern.permute.xlu1 %v2017_v2  ;;  %1745 = vset.pattern.permute.xlu0 %v2018_v3  ;;  %v1755_v5 = vld [vmem:[#allocation3 + $0x30] sm:$0xff]   ;;  %v2021_v7 = vmov 1   ;;  %v1756_v8 = vld [vmem:[#allocation3 + $0x28] sm:$0xff]   ;;  %v2022_v9 = vmov 4   ;;  %v2023_v10 = vmov 5   ;;  %v1757_v11 = vld [vmem:[#allocation3 + $0x20] sm:$0xff]   ;;  %v448_v31 = vlaneseq }
  0x6b   : > { %465 = vperm.xlu1 %1747, %v447_v0   ;;  %451 = vperm.xlu0 %1745, %v447_v0   ;;  %v2024_v12 = vmov 6   ;;  %v2025_v13 = vmov 7   ;;  %v1758_v14 = vld [vmem:[#allocation3 + $0x18] sm:$0xff]   ;;  %v1759_v15 = vld [vmem:[#allocation3 + $0x10] sm:$0xff]   ;;  %vm2026_vm0 = vmmov 0   ;;  %v1760_v19 = vld [vmem:[#allocation3 + $0x8] sm:$0xff]  }
  0x6c   : > { %1637 = vmatprep.subr.bf16.mxu0 %v2019_v4  ;;  %760 = vmatprep.mubr.bf16.mxu1 %v2018_v3  ;;  %v1762_v16 = vld [vmem:[%s2466_s4 + $0x74] ss:$8 sps:$4 sm:$0xff]   ;;  %v1764_v17 = vld [vmem:[%s2466_s4 + $0x70] ss:$8 sps:$4 sm:$0xff]   ;;  %v1765_v18 = vld [vmem:[%s2466_s4 + $0x64] ss:$8 sps:$4 sm:$0xff]  }
  0x6d   : > { %1638 = vmatpush3.bf16.msra.mxu0 %v1754_v1  ;;  %1653 = vmatprep.mubr.msk.bf16.mxu0 %vm2026_vm0, %v2019_v4  ;;  %v1767_v20 = vld [vmem:[%s2466_s4 + $0x60] ss:$8 sps:$4 sm:$0xff]   ;;  %v1768_v21 = vld [vmem:[%s2466_s4 + $0x54] ss:$8 sps:$4 sm:$0xff]   ;;  %v1770_v23 = vld [vmem:[%s2466_s4 + $0x50] ss:$8 sps:$4 sm:$0xff]  }
  0x6e   : > { %1639 = vmatprep.subr.bf16.mxu0 %v2019_v4  ;;  %728 = vmatprep.subr.bf16.mxu1 %v1762_v16  ;;  %v1761_v22 = vld [vmem:[#allocation3] sm:$0xff]   ;;  %v1771_v24 = vld [vmem:[%s2466_s4 + $0x44] ss:$8 sps:$4 sm:$0xff]   ;;  %v1773_v25 = vld [vmem:[%s2466_s4 + $0x40] ss:$8 sps:$4 sm:$0xff]   ;;  %v449_v34 = vand.u32 127, %v448_v31 }
  0x6f   : > { %1748 = vset.pattern.permute.xlu1 %v2020_v6  ;;  %1746 = vset.pattern.permute.xlu0 %v2021_v7  ;;  %v1774_v26 = vld [vmem:[%s2466_s4 + $0x34] ss:$8 sps:$4 sm:$0xff]   ;;  %v1776_v27 = vld [vmem:[%s2466_s4 + $0x30] ss:$8 sps:$4 sm:$0xff]   ;;  %v1777_v28 = vld [vmem:[%s2466_s4 + $0x24] ss:$8 sps:$4 sm:$0xff]  }
  0x70   : > { %472 = vperm.xlu1 %1748, %v447_v0   ;;  %458 = vperm.xlu0 %1746, %v447_v0   ;;  %v1779_v29 = vld [vmem:[%s2466_s4 + $0x20] ss:$8 sps:$4 sm:$0xff]   ;;  %v1780_v30 = vld [vmem:[%s2466_s4 + $0x14] ss:$8 sps:$4 sm:$0xff]   ;;  %v1782_v57 = vld [vmem:[%s2466_s4 + $0x10] ss:$8 sps:$4 sm:$0xff]  }
  0x71   : > { %1640 = vmatpush3.bf16.msra.mxu0 %v1755_v5  ;;  %729 = vmatpush1.bf16.msra.mxu1 %v1764_v17  ;;  %v1783_v58 = vld [vmem:[%s2466_s4 + $0x4] ss:$8 sps:$4 sm:$0xff]   ;;  %v1785_v59 = vld [vmem:[%s2466_s4] ss:$8 sps:$4 sm:$0xff]  }
  0x72   : > { %1641 = vmatprep.subr.bf16.mxu0 %v2019_v4  ;;  %730 = vmatprep.subr.bf16.mxu1 %v1765_v18  ;;  %v1523_v60 = vld [vmem:[%s2465_s3] ss:$0 sm:$0xff] }
  0x73   : > { %v636_v6 = vld [vmem:[%s2467_s5] sm:$0x3] }
  0x74   : > { %1749 = vset.pattern.permute.xlu1 %v2022_v9  ;;  %1750 = vset.pattern.permute.xlu0 %v2023_v10 }
  0x75   : > { %479 = vperm.xlu1 %1749, %v447_v0   ;;  %486 = vperm.xlu0 %1750, %v447_v0  }
  0x76   : > { %1642 = vmatpush3.bf16.msra.mxu0 %v1756_v8  ;;  %731 = vmatpush1.bf16.msra.mxu1 %v1767_v20 }
  0x77   : > { %1643 = vmatprep.subr.bf16.mxu0 %v2019_v4  ;;  %732 = vmatprep.subr.bf16.mxu1 %v1768_v21 }
  0x79   : > { %1751 = vset.pattern.permute.xlu1 %v2024_v12  ;;  %1753 = vset.pattern.permute.xlu0 %v2025_v13 }
  0x7a   : > { %493 = vperm.xlu1 %1751, %v447_v0   ;;  %1644 = vmatpush3.bf16.msra.mxu0 %v1757_v11 }
  0x7b   : > { %1645 = vmatprep.subr.bf16.mxu0 %v2019_v4  ;;  %733 = vmatpush1.bf16.msra.mxu1 %v1770_v23 }
  0x7c   : > { %734 = vmatprep.subr.bf16.mxu1 %v1771_v24 }
  0x7e   : > { %1752 = vset.pattern.permute.xlu1 %v2025_v13  ;;  %1646 = vmatpush3.bf16.msra.mxu0 %v1758_v14 }
  0x7f   : > { %500 = vperm.xlu1 %1752, %v447_v0   ;;  %1647 = vmatprep.subr.bf16.mxu0 %v2019_v4 }
  0x80   : > { %735 = vmatpush1.bf16.msra.mxu1 %v1773_v25 }
  0x81   : > { %736 = vmatprep.subr.bf16.mxu1 %v1774_v26 }
  0x82   : > { %1648 = vmatpush3.bf16.msra.mxu0 %v1759_v15 }
  0x83   : > { %1649 = vmatprep.subr.bf16.mxu0 %v2019_v4 }
  0x84   : > { %737 = vmatpush1.bf16.msra.mxu1 %v1776_v27 }
  0x85   : > { %738 = vmatprep.subr.bf16.mxu1 %v1777_v28 }
  0x86   : > { %1650 = vmatpush3.bf16.msra.mxu0 %v1760_v19 }
  0x87   : > { %1651 = vmatprep.subr.bf16.mxu0 %v2019_v4 }
  0x88   : > { %739 = vmatpush1.bf16.msra.mxu1 %v1779_v29 }
  0x89   : > { %740 = vmatprep.subr.bf16.mxu1 %v1780_v30 }
  0x8a   : > { %1652 = vmatpush3.bf16.msra.mxu0 %v1761_v22 }
  0x8c   : > { %741 = vmatpush1.bf16.msra.mxu1 %v1782_v57 }
  0x8d   : > { %742 = vmatprep.subr.bf16.mxu1 %v1783_v58 }
  0x90   : > { %743 = vmatpush1.bf16.msra.mxu1 %v1785_v59 }
  0xe6   : > { %v466_v32 = vpop.permute.xlu1 %465  ;;  %v452_v33 = vpop.permute.xlu0 %451 }
  0xe7   : > { %vm453_vm1 = vcmp.eq.s32.totalorder %v449_v34, %v452_v33  ;;  %vm467_vm2 = vcmp.eq.s32.totalorder %v449_v34, %v466_v32 }
  0xe8   : > { %v1515_v37 = vsel %vm453_vm1, 1.0, %v2019_v4  ;;  %v1517_v40 = vsel %vm467_vm2, 1.0, %v2019_v4 }
  0xeb   : > { %v473_v35 = vpop.permute.xlu1 %472  ;;  %v459_v36 = vpop.permute.xlu0 %458 }
  0xec   : > { %vm460_vm3 = vcmp.eq.s32.totalorder %v449_v34, %v459_v36  ;;  %vm474_vm4 = vcmp.eq.s32.totalorder %v449_v34, %v473_v35 }
  0xed   : > { %v1516_v38 = vsel %vm460_vm3, 1.0, %v2019_v4  ;;  %v1518_v44 = vsel %vm474_vm4, 1.0, %v2019_v4 }
  0xee   : > { %v463_v39 = vadd.f32 %v1516_v38, %v1515_v37 }
  0xf0   : > { %v470_v41 = vadd.f32 %v1517_v40, %v463_v39  ;;  %v480_v42 = vpop.permute.xlu1 %479  ;;  %v487_v43 = vpop.permute.xlu0 %486 }
  0xf1   : > { %vm481_vm5 = vcmp.eq.s32.totalorder %v449_v34, %v480_v42  ;;  %vm488_vm6 = vcmp.eq.s32.totalorder %v449_v34, %v487_v43 }
  0xf2   : > { %v477_v45 = vadd.f32 %v1518_v44, %v470_v41  ;;  %v1519_v46 = vsel %vm481_vm5, 1.0, %v2019_v4  ;;  %v1520_v48 = vsel %vm488_vm6, 1.0, %v2019_v4 }
  0xf4   : > { %v484_v47 = vadd.f32 %v1519_v46, %v477_v45 }
  0xf5   : > { %v494_v49 = vpop.permute.xlu1 %493 }
  0xf6   : > { %vm495_vm7 = vcmp.eq.s32.totalorder %v449_v34, %v494_v49  ;;  %v491_v50 = vadd.f32 %v1520_v48, %v484_v47 }
  0xf7   : > { %v1521_v51 = vsel %vm495_vm7, 1.0, %v2019_v4 }
  0xf8   : > { %v498_v53 = vadd.f32 %v1521_v51, %v491_v50 }
  0xfa   : > { %v501_v52 = vpop.permute.xlu1 %500 }
  0xfb   : > { %vm502_vm8 = vcmp.eq.s32.totalorder %v449_v34, %v501_v52 }
  0xfc   : > { %v1522_v54 = vsel %vm502_vm8, 1.0, %v2019_v4  ;;  %v639_v4 = vshrl.u32 %v448_v31, 7 }
  0xfd   : > { %v505_v55 = vadd.f32 %v1522_v54, %v498_v53 }
  0xfe   : > { %v640_v5 = vsub.s32 0, %v639_v4  ;;  %v644_v7 = vsub.s32 1, %v639_v4 }
  0xff   : > { %v522_v56 = vpack.c.bf16 %v505_v55, %v505_v55 }
 0x100   : > { %v641_v8 = vrot.slane %v636_v6, %v640_v5  ;;  %v645_v9 = vrot.slane %v636_v6, %v644_v7 }
 0x101   : > { %1654 = vmatmul.mubr.bf16.vlgmr.msra.gmra.mxu0 %v522_v56 }
 0x1c1   : > { %v612_v61 = vpop.f32.mrf.mxu0 }
 0x1c2   : > { %v613_v62 = vadd.f32 %v1523_v60, %v612_v61 }
 0x1c3   : > { %v1655_v63 = vpop.f32.mrf.mxu0 }
 0x1c4   : > { %v618_v0 = vmax.f32 %v613_v62, 0.0 }
 0x1c5   : > { %v615_v1 = vpop.f32.mrf.mxu0 }
 0x1c6   : > { %v635_v2 = vpack.c.bf16 %v618_v0, %v618_v0 }
 0x1c7   : > { %v1656_v3 = vpop.f32.mrf.mxu0 }
 0x1c8   : > { %761 = vmatmul.mubr.bf16.vlgmr.msra.gmra.mxu1 %v635_v2 }
 0x288   : > { %v762_v10 = vpop.f32.mrf.mxu1 }
 0x289   : > { %v763_v11 = vadd.f32 %v762_v10, %v641_v8 }
 0x28a   : > { %v764_v12 = vpop.f32.mrf.mxu1 }
 0x28b   : > { %v769_v13 = vmax.f32 %v763_v11, 0.0  ;;  %v765_v14 = vadd.f32 %v764_v12, %v645_v9 }
 0x28c   : > { %v766_v15 = vpop.f32.mrf.mxu1 }
 0x28d   : > { %771 = vst [vmem:[#allocation2] sm:$0xff] %v769_v13  ;;  %v770_v16 = vmax.f32 %v765_v14, 0.0 }
 0x28e   : > { %v767_v17 = vpop.f32.mrf.mxu1 }
 0x28f   : > { %772 = vst [vmem:[#allocation2 + $0x8] sm:$0xff] %v770_v16 }
 0x290 PF: > { %v1786_v18 = vld [vmem:[%s2241_s17 + $0x74] ss:$8 sps:$4 sm:$0xff]   ;;  %v1788_v19 = vld [vmem:[%s2241_s17 + $0x70] ss:$8 sps:$4 sm:$0xff]   ;;  %v1789_v20 = vld [vmem:[%s2241_s17 + $0x64] ss:$8 sps:$4 sm:$0xff]   ;;  %v811_v54 = vlaneseq }
 0x291   : > { %989 = vmatprep.subr.bf16.mxu0 %v1786_v18  ;;  %v1791_v21 = vld [vmem:[%s2241_s17 + $0x60] ss:$8 sps:$4 sm:$0xff]   ;;  %v1792_v22 = vld [vmem:[%s2241_s17 + $0x54] ss:$8 sps:$4 sm:$0xff]   ;;  %v1794_v23 = vld [vmem:[%s2241_s17 + $0x50] ss:$8 sps:$4 sm:$0xff]  }
 0x292   : > { %990 = vmatpush1.bf16.msra.mxu0 %v1788_v19  ;;  %v1795_v24 = vld [vmem:[%s2241_s17 + $0x44] ss:$8 sps:$4 sm:$0xff]   ;;  %v1797_v25 = vld [vmem:[%s2241_s17 + $0x40] ss:$8 sps:$4 sm:$0xff]   ;;  %v1798_v26 = vld [vmem:[%s2241_s17 + $0x34] ss:$8 sps:$4 sm:$0xff]  }
 0x293   : > { %991 = vmatprep.subr.bf16.mxu0 %v1789_v20  ;;  %v1800_v27 = vld [vmem:[%s2241_s17 + $0x30] ss:$8 sps:$4 sm:$0xff]   ;;  %v1801_v28 = vld [vmem:[%s2241_s17 + $0x24] ss:$8 sps:$4 sm:$0xff]   ;;  %v1803_v29 = vld [vmem:[%s2241_s17 + $0x20] ss:$8 sps:$4 sm:$0xff]  }
 0x294   : > { %v1804_v30 = vld [vmem:[%s2241_s17 + $0x14] ss:$8 sps:$4 sm:$0xff]   ;;  %v1806_v33 = vld [vmem:[%s2241_s17 + $0x10] ss:$8 sps:$4 sm:$0xff]   ;;  %v1807_v34 = vld [vmem:[%s2241_s17 + $0x4] ss:$8 sps:$4 sm:$0xff]  }
 0x295   : > { %v1809_v35 = vld [vmem:[%s2241_s17] ss:$8 sps:$4 sm:$0xff]   ;;  %v1810_v36 = vld [vmem:[%s2241_s17 + $0xf4] ss:$8 sps:$4 sm:$0xff]   ;;  %v1812_v37 = vld [vmem:[%s2241_s17 + $0xf0] ss:$8 sps:$4 sm:$0xff]  }
 0x296   : > { %992 = vmatpush1.bf16.msra.mxu0 %v1791_v21  ;;  %v807_v31 = vld [vmem:[#allocation2 + $0x8] sm:$0xff]  ;;  %v1813_v38 = vld [vmem:[%s2241_s17 + $0xe4] ss:$8 sps:$4 sm:$0xff]   ;;  %v1815_v39 = vld [vmem:[%s2241_s17 + $0xe0] ss:$8 sps:$4 sm:$0xff]   ;;  %v2359_v55 = vshrl.u32 %v811_v54, 7 }
 0x297   : > { %993 = vmatprep.subr.bf16.mxu0 %v1792_v22  ;;  %v809_v32 = vpack.c.bf16 %v807_v31, %v807_v31  ;;  %v1816_v40 = vld [vmem:[%s2241_s17 + $0xd4] ss:$8 sps:$4 sm:$0xff]   ;;  %v1818_v41 = vld [vmem:[%s2241_s17 + $0xd0] ss:$8 sps:$4 sm:$0xff]   ;;  %v1819_v42 = vld [vmem:[%s2241_s17 + $0xc4] ss:$8 sps:$4 sm:$0xff]  }
 0x298   : > { %v1821_v43 = vld [vmem:[%s2241_s17 + $0xc0] ss:$8 sps:$4 sm:$0xff]   ;;  %v1822_v44 = vld [vmem:[%s2241_s17 + $0xb4] ss:$8 sps:$4 sm:$0xff]   ;;  %v1824_v45 = vld [vmem:[%s2241_s17 + $0xb0] ss:$8 sps:$4 sm:$0xff]  }
 0x299   : > { %1021 = vmatprep.mubr.bf16.mxu0 %v809_v32  ;;  %v1825_v46 = vld [vmem:[%s2241_s17 + $0xa4] ss:$8 sps:$4 sm:$0xff]   ;;  %v1827_v47 = vld [vmem:[%s2241_s17 + $0xa0] ss:$8 sps:$4 sm:$0xff]   ;;  %v1828_v48 = vld [vmem:[%s2241_s17 + $0x94] ss:$8 sps:$4 sm:$0xff]  }
 0x29a   : > { %994 = vmatpush1.bf16.msra.mxu0 %v1794_v23  ;;  %v1830_v49 = vld [vmem:[%s2241_s17 + $0x90] ss:$8 sps:$4 sm:$0xff]   ;;  %v1831_v50 = vld [vmem:[%s2241_s17 + $0x84] ss:$8 sps:$4 sm:$0xff]   ;;  %v1833_v51 = vld [vmem:[%s2241_s17 + $0x80] ss:$8 sps:$4 sm:$0xff]  }
 0x29b   : > { %995 = vmatprep.subr.bf16.mxu0 %v1795_v24  ;;  %v806_v52 = vld [vmem:[#allocation2] sm:$0xff]  ;;  %v813_v56 = vsub.s32 0, %v2359_v55  ;;  %v2364_v57 = vld [vmem:[%s403_s16] sm:$0x77]  ;;  %v817_v58 = vsub.s32 4, %v2359_v55  ;;  %p1580_p0 = scmp.ne.s32.totalorder %s2167_s29, 4 }
 0x29c   : > { %v808_v53 = vpack.c.bf16 %v806_v52, %v806_v52  ;;  %v1105_v52 = vsub.s32 2, %v2359_v55 }
 0x29d   : > { %v814_v59 = vrot.slane %v2364_v57, %v813_v56  ;;  %v818_v60 = vrot.slane %v2364_v57, %v817_v58 }
 0x29e   : > { %996 = vmatpush1.bf16.msra.mxu0 %v1797_v25 }
 0x29f   : > { %997 = vmatprep.subr.bf16.mxu0 %v1798_v26  ;;  %v824_v61 = vrot.slane %v814_v59, %v813_v56  ;;  %v828_v62 = vrot.slane %v818_v60, %v813_v56 }
 0x2a2   : > { %998 = vmatpush1.bf16.msra.mxu0 %v1800_v27 }
 0x2a3   : > { %999 = vmatprep.subr.bf16.mxu0 %v1801_v28 }
 0x2a6   : > { %1000 = vmatpush1.bf16.msra.mxu0 %v1803_v29 }
 0x2a7   : > { %1001 = vmatprep.subr.bf16.mxu0 %v1804_v30 }
 0x2aa   : > { %1002 = vmatpush1.bf16.msra.mxu0 %v1806_v33 }
 0x2ab   : > { %1003 = vmatprep.subr.bf16.mxu0 %v1807_v34 }
 0x2ae   : > { %1004 = vmatpush1.bf16.msra.mxu0 %v1809_v35 }
 0x2af   : > { %1005 = vmatprep.subr.bf16.mxu0 %v1810_v36 }
 0x2b2   : > { %1006 = vmatpush2.bf16.msra.mxu0 %v1812_v37 }
 0x2b3   : > { %1007 = vmatprep.subr.bf16.mxu0 %v1813_v38 }
 0x2b6   : > { %1008 = vmatpush2.bf16.msra.mxu0 %v1815_v39 }
 0x2b7   : > { %1009 = vmatprep.subr.bf16.mxu0 %v1816_v40 }
 0x2ba   : > { %1010 = vmatpush2.bf16.msra.mxu0 %v1818_v41 }
 0x2bb   : > { %1011 = vmatprep.subr.bf16.mxu0 %v1819_v42 }
 0x2be   : > { %1012 = vmatpush2.bf16.msra.mxu0 %v1821_v43  ;;  %v1076_v43 = vsub.s32 1, %v2359_v55 }
 0x2bf   : > { %1013 = vmatprep.subr.bf16.mxu0 %v1822_v44  ;;  %v1080_v44 = vsub.s32 5, %v2359_v55 }
 0x2c2   : > { %1014 = vmatpush2.bf16.msra.mxu0 %v1824_v45 }
 0x2c3   : > { %1015 = vmatprep.subr.bf16.mxu0 %v1825_v46 }
 0x2c6   : > { %1016 = vmatpush2.bf16.msra.mxu0 %v1827_v47 }
 0x2c7   : > { %1017 = vmatprep.subr.bf16.mxu0 %v1828_v48 }
 0x2ca   : > { %1018 = vmatpush2.bf16.msra.mxu0 %v1830_v49 }
 0x2cb   : > { %1019 = vmatprep.subr.bf16.mxu0 %v1831_v50 }
 0x2ce   : > { %1020 = vmatpush2.bf16.msra.mxu0 %v1833_v51 }
 0x2d1   : > { %1022 = vmatmul.mubr.bf16.vlgmr.msra.gmra.mxu0 %v808_v53  ;;  %v1109_v53 = vsub.s32 6, %v2359_v55 }
 0x391   : > { %v1023_v63 = vpop.f32.mrf.mxu0 }
 0x392   : > { %v1024_v0 = vadd.f32 %v1023_v63, %v824_v61 }
 0x393   : > { %v1025_v1 = vpop.f32.mrf.mxu0 }
 0x394   : > { %v1030_v2 = vrot.slane %v1024_v0, 4  ;;  %v1026_v3 = vadd.f32 %v1025_v1, %v828_v62 }
 0x395   : > { %v1027_v4 = vpop.f32.mrf.mxu0 }
 0x396   : > { %v1031_v5 = vadd.f32 %v1030_v2, %v1024_v0  ;;  %v1036_v6 = vrot.slane %v1026_v3, 4 }
 0x397   : > { %v1028_v7 = vpop.f32.mrf.mxu0 }
 0x398   : > { %v1032_v8 = vrot.slane %v1031_v5, 2  ;;  %v1037_v9 = vadd.f32 %v1036_v6, %v1026_v3 }
 0x39a   : > { %v1033_v10 = vadd.f32 %v1032_v8, %v1031_v5  ;;  %v1038_v11 = vrot.slane %v1037_v9, 2 }
 0x39c   : > { %v1034_v12 = vrot.slane %v1033_v10, 1  ;;  %v1039_v13 = vadd.f32 %v1038_v11, %v1037_v9 }
 0x39e   : > { %v1035_v14 = vadd.f32 %v1034_v12, %v1033_v10  ;;  %v1040_v15 = vrot.slane %v1039_v13, 1 }
 0x3a0   : > { %v1043_v16 = vmul.f32 0.125, %v1035_v14  ;;  %v1041_v17 = vadd.f32 %v1040_v15, %v1039_v13 }
 0x3a2   : > { %v1045_v18 = vsub.f32 %v1024_v0, %v1043_v16  ;;  %v1044_v19 = vmul.f32 0.125, %v1041_v17 }
 0x3a4   : > { %v1047_v20 = vmul.f32 %v1045_v18, %v1045_v18  ;;  %v1046_v21 = vsub.f32 %v1026_v3, %v1044_v19 }
 0x3a6   : > { %v1049_v22 = vrot.slane %v1047_v20, 4  ;;  %v1048_v23 = vmul.f32 %v1046_v21, %v1046_v21 }
 0x3a8   : > { %v1050_v24 = vadd.f32 %v1049_v22, %v1047_v20  ;;  %v1055_v25 = vrot.slane %v1048_v23, 4 }
 0x3aa   : > { %v1051_v26 = vrot.slane %v1050_v24, 2  ;;  %v1056_v27 = vadd.f32 %v1055_v25, %v1048_v23 }
 0x3ac   : > { %v1052_v28 = vadd.f32 %v1051_v26, %v1050_v24  ;;  %v1057_v29 = vrot.slane %v1056_v27, 2 }
 0x3ae   : > { %v1053_v30 = vrot.slane %v1052_v28, 1  ;;  %v1058_v31 = vadd.f32 %v1057_v29, %v1056_v27 }
 0x3b0   : > { %v1054_v32 = vadd.f32 %v1053_v30, %v1052_v28  ;;  %v1059_v33 = vrot.slane %v1058_v31, 1 }
 0x3b2   : > { %v1061_v34 = vmul.f32 0.125, %v1054_v32  ;;  %v1060_v35 = vadd.f32 %v1059_v33, %v1058_v31 }
 0x3b4   : > { %v1063_v36 = vadd.f32 1e-05, %v1061_v34  ;;  %v1062_v37 = vmul.f32 0.125, %v1060_v35 }
 0x3b6   : > { %v1064_v38 = vadd.f32 1e-05, %v1062_v37  ;;  %1834 = vrsqrt.f32 %v1063_v36 }
 0x3b8   : > { %1836 = vrsqrt.f32 %v1064_v38 }
 0x3c3   : > { %v1835_v39 = vpop.eup %1834 }
 0x3c5   : > { %v1837_v40 = vpop.eup %1836 }
 0x3c6   : > { %v1069_v41 = vcombine.low %v1835_v39, %v1837_v40 }
 0x3c8   : > { %v1070_v42 = vrot.slane %v1069_v41, 7 }
 0x3ca   : > { %v1072_v45 = vmul.f32 %v1070_v42, %v2364_v57 }
 0x3cc   : > { %v1077_v46 = vrot.slane %v1072_v45, %v1076_v43  ;;  %v1081_v47 = vrot.slane %v1072_v45, %v1080_v44 }
 0x3ce   : > { %v1094_v48 = vmul.f32 %v1077_v46, %v1043_v16  ;;  %v1095_v49 = vmul.f32 %v1081_v47, %v1044_v19  ;;  %v1087_v56 = vrot.slane %v1077_v46, %v1076_v43  ;;  %v1091_v58 = vrot.slane %v1081_v47, %v1076_v43 }
 0x3d0   : > { %v1098_v50 = vcombine.low %v1094_v48, %v1095_v49  ;;  %v1092_v62 = vmul.f32 %v1087_v56, %v1024_v0  ;;  %v1093_v63 = vmul.f32 %v1091_v58, %v1026_v3 }
 0x3d2   : > { %v1099_v51 = vrot.slane %v1098_v50, 6 }
 0x3d4   : > { %v1101_v59 = vsub.f32 %v2364_v57, %v1099_v51 }
 0x3d6   : > { %v1106_v60 = vrot.slane %v1101_v59, %v1105_v52  ;;  %v1110_v61 = vrot.slane %v1101_v59, %v1109_v53 }
 0x3d8   : > { %v1116_v1 = vrot.slane %v1106_v60, %v1105_v52  ;;  %v1120_v2 = vrot.slane %v1110_v61, %v1105_v52 }
 0x3da   : > { %v1121_v4 = vadd.f32 %v1116_v1, %v1092_v62  ;;  %v1122_v5 = vadd.f32 %v1120_v2, %v1093_v63  ;;  %1130 = sbr.rel (%p1580_p0) target bundleno = 1870 (0x74e), region = 80 }
 0x3dc   : > { %v1123_v6 = vmax.f32 %v1121_v4, 0.0  ;;  %v1124_v7 = vmax.f32 %v1122_v5, 0.0 }
 0x3de   : > { %1125 = vst [vmem:[#allocation2] sm:$0xff] %v1123_v6  ;;  %1126 = vst [vmem:[#allocation2 + $0x8] sm:$0xff] %v1124_v7 }
 0x3df   : > { %v1840_v55 = vld [vmem:[%s2470_s8 + $0x78] sm:$0xff]   ;;  %v2027_v0 = vmov 0   ;;  %v1842_v3 = vld [vmem:[%s2470_s8 + $0x70] sm:$0xff]   ;;  %v1844_v9 = vld [vmem:[%s2470_s8 + $0x68] sm:$0xff]   ;;  %vm1311_vm9 = vcmask 130048   ;;  %v1325_v34 = vand.u32 127, %v811_v54 }
 0x3e0   : > { %v1841_v57 = vld [vmem:[%s2470_s8 + $0x38] sm:$0xff]   ;;  %1838 = vset.pattern.permute.xlu1 %v2027_v0  ;;  %1839 = vset.pattern.permute.xlu0 %v2027_v0  ;;  %v1843_v8 = vld [vmem:[%s2470_s8 + $0x30] sm:$0xff]   ;;  %v1845_v10 = vld [vmem:[%s2470_s8 + $0x28] sm:$0xff]   ;;  %vm1335_vm13 = vcmask 7168  }
 0x3e1   : > { %1615 = vmatprep.subr.bf16.mxu0 %v1840_v55  ;;  %v1846_v11 = vld [vmem:[%s2470_s8 + $0x60] sm:$0xff]   ;;  %v1848_v13 = vld [vmem:[%s2470_s8 + $0x58] sm:$0xff]   ;;  %v1850_v15 = vld [vmem:[%s2470_s8 + $0x50] sm:$0xff]  }
 0x3e2   : > { %1616 = vmatpush3.bf16.msra.mxu0 %v1841_v57  ;;  %v1847_v12 = vld [vmem:[%s2470_s8 + $0x20] sm:$0xff]   ;;  %v1849_v14 = vld [vmem:[%s2470_s8 + $0x18] sm:$0xff]   ;;  %v1851_v19 = vld [vmem:[%s2470_s8 + $0x10] sm:$0xff]  }
 0x3e3   : > { %1617 = vmatprep.subr.bf16.mxu0 %v1842_v3  ;;  %v2414_v17 = vld [vmem:[%s2463_s1] sm:$0xff]  ;;  %v1852_v20 = vld [vmem:[%s2470_s8 + $0x48] sm:$0xff]  }
 0x3e4   : > { %1327 = vperm.xlu1 %1838, %v2414_v17   ;;  %v1853_v21 = vld [vmem:[%s2470_s8 + $0x8] sm:$0xff]   ;;  %v1854_v22 = vld [vmem:[%s2470_s8 + $0x40] sm:$0xff]  }
 0x3e5   : > { %v1132_v16 = vld [vmem:[#allocation2 + $0x8] sm:$0xff]  ;;  %v1855_v23 = vld [vmem:[%s2470_s8] sm:$0xff]  }
 0x3e6   : > { %1618 = vmatpush3.bf16.msra.mxu0 %v1843_v8  ;;  %v1166_v18 = vpack.c.bf16 %v1132_v16, %v1132_v16  ;;  %v1131_v24 = vld [vmem:[#allocation2] sm:$0xff] }
 0x3e7   : > { %1619 = vmatprep.subr.bf16.mxu0 %v1844_v9  ;;  %v1165_v25 = vpack.c.bf16 %v1131_v24, %v1131_v24  ;;  %v1581_v27 = vld [vmem:[%s2471_s9] ss:$0 sm:$0xff] }
 0x3e8   : > { %1302 = vmatprep.mubr.bf16.mxu0 %v1166_v18 }
 0x3ea   : > { %1620 = vmatpush3.bf16.msra.mxu0 %v1845_v10 }
 0x3eb   : > { %1621 = vmatprep.subr.bf16.mxu0 %v1846_v11 }
 0x3ee   : > { %1622 = vmatpush3.bf16.msra.mxu0 %v1847_v12 }
 0x3ef   : > { %1623 = vmatprep.subr.bf16.mxu0 %v1848_v13 }
 0x3f2   : > { %1624 = vmatpush3.bf16.msra.mxu0 %v1849_v14 }
 0x3f3   : > { %1625 = vmatprep.subr.bf16.mxu0 %v1850_v15 }
 0x3f6   : > { %1626 = vmatpush3.bf16.msra.mxu0 %v1851_v19 }
 0x3f7   : > { %1627 = vmatprep.subr.bf16.mxu0 %v1852_v20 }
 0x3fa   : > { %1628 = vmatpush3.bf16.msra.mxu0 %v1853_v21 }
 0x3fb   : > { %1629 = vmatprep.subr.bf16.mxu0 %v1854_v22 }
 0x3fe   : > { %1630 = vmatpush3.bf16.msra.mxu0 %v1855_v23 }
 0x401   : > { %1303 = vmatmul.mubr.bf16.vlgmr.msra.gmra.mxu0 %v1165_v25 }
 0x45f   : > { %v1328_v45 = vpop.permute.xlu1 %1327 }
 0x460   : > { %vm1329_vm11 = vcmp.eq.s32.totalorder %v1325_v34, %v1328_v45 }
 0x4c1   : > { %v1631_v26 = vpop.f32.mrf.mxu0 }
 0x4c3   : > { %v1632_v28 = vpop.f32.mrf.mxu0 }
 0x4c4   : > { %v1633_v29 = vadd.f32 %v1632_v28, %v1631_v26 }
 0x4c5   : > { %v1634_v30 = vpop.f32.mrf.mxu0 }
 0x4c6   : > { %v1305_v31 = vadd.f32 %v1633_v29, %v1581_v27 }
 0x4c7   : > { %v1635_v32 = vpop.f32.mrf.mxu0 }
 0x4c8   : > { %v1312_v33 = vsel %vm1311_vm9, %v1305_v31, -inf  ;;  %v1330_v48 = vsel %vm1329_vm11, %v1305_v31, 0.0 }
 0x4c9   : > { %1313 = vmax.xlane.f32.xlu0 %v1312_v33  ;;  %v1331_v49 = vsel %vm1311_vm9, %v1330_v48, 0.0 }
 0x552   : > { %v1314_v35 = vpop.xlane.xlu0 %1313 }
 0x553   : > { %v1315_v36 = vsub.f32 %v1305_v31, %v1314_v35  ;;  %vm1351_vm10 = vcmp.eq.f32.partialorder %v1305_v31, %v1314_v35 }
 0x554   : > { %v1352_v37 = vsel %vm1351_vm10, %v1325_v34, 16 }
 0x555   : > { %v1316_v38 = vmul.f32 1.442695, %v1315_v36  ;;  %v1353_v39 = vsel %vm1311_vm9, %v1352_v37, 2147483647 }
 0x556   : > { %v1355_v40 = vshra.s32 %v1353_v39, 16  ;;  %v1354_v44 = vand.u32 65535, %v1353_v39 }
 0x557   : > { %1856 = vpow2.f32 %v1316_v38 }
 0x558   : > { %v1357_v41 = vcvt.s32.f32 %v1355_v40  ;;  %v1356_v54 = vcvt.s32.f32 %v1354_v44 }
 0x55a   : > { %1358 = vmin.xlane.f32.xlu0 %v1357_v41 }
 0x564   : > { %v1857_v42 = vpop.eup %1856 }
 0x565   : > { %v1318_v43 = vsel %vm1311_vm9, %v1857_v42, 0.0 }
 0x566   : > { %1319 = vadd.xlane.f32.xlu1 %v1318_v43 }
 0x5e3   : > { %v1359_v46 = vpop.xlane.xlu0 %1358 }
 0x5e4   : > { %vm1360_vm12 = vcmp.eq.f32.partialorder %v1357_v41, %v1359_v46  ;;  %v1365_v51 = vcvt.f32.s32 %v1359_v46 }
 0x5e5   : > { %v1361_v47 = vsel %vm1360_vm12, %v1356_v54, inf }
 0x5e6   : > { %1362 = vmin.xlane.f32.xlu0 %v1361_v47  ;;  %v1366_v53 = vshll.u32 %v1365_v51, 16 }
 0x5ea   : > { %1332 = vadd.xlane.f32.xlu0 %v1331_v49 }
 0x5ef   : > { %v1320_v50 = vpop.xlane.xlu1 %1319 }
 0x5f0   : > { %1858 = vlog2.f32 %v1320_v50 }
 0x5fd   : > { %v1859_v59 = vpop.eup %1858 }
 0x5fe   : > { %v1322_v63 = vmul.f32 0.6931472, %v1859_v59 }
 0x600   : > { %v1323_v5 = vadd.f32 %v1322_v63, %v1314_v35 }
 0x66f   : > { %v1363_v52 = vpop.xlane.xlu0 %1362 }
 0x670   : > { %v1364_v56 = vcvt.f32.s32 %v1363_v52 }
 0x672   : > { %v1367_v58 = vadd.s32 %v1366_v53, %v1364_v56 }
 0x673   : > { %v1333_v4 = vpop.xlane.xlu0 %1332 }
 0x674   : > { %vm1368_vm14 = vcmp.eq.s32.totalorder %v1367_v58, %v2414_v17  ;;  %v1334_v7 = vsub.f32 %v1323_v5, %v1333_v4 }
 0x675   : > { %v1369_v60 = vsel %vm1368_vm14, 1, %v2027_v0 }
 0x676   : > { %v1370_v61 = vsel %vm1335_vm13, %v1369_v60, 0  ;;  %v1336_v55 = vsel %vm1335_vm13, %v1334_v7, 0.0 }
 0x677   : > { %v1372_v62 = vshrl.u32 %v1370_v61, 16  ;;  %v1371_v2 = vand.u32 65535, %v1370_v61 }
 0x679   : > { %v1374_v1 = vcvt.s32.f32 %v1372_v62  ;;  %v1373_v6 = vcvt.s32.f32 %v1371_v2 }
 0x67b   : > { %1377 = vadd.xlane.f32.xlu0 %v1374_v1 }
 0x67f   : > { %1375 = vadd.xlane.f32.xlu0 %v1373_v6 }
 0x683   : > { %1337 = vadd.xlane.f32.xlu0 %v1336_v55 }
 0x704   : > { %v1378_v57 = vpop.xlane.xlu0 %1377 }
 0x705   : > { %v1380_v3 = vcvt.f32.s32 %v1378_v57 }
 0x707   : > { %v1381_v9 = vshll.u32 %v1380_v3, 16 }
 0x708   : > { %v1376_v8 = vpop.xlane.xlu0 %1375 }
 0x709   : > { %v1379_v10 = vcvt.f32.s32 %v1376_v8 }
 0x70b   : > { %v1382_v11 = vadd.s32 %v1381_v9, %v1379_v10 }
 0x70c   : > { %v1338_v0 = vpop.xlane.xlu0 %1337 }
 0x70d   : > { %v1383_v12 = vrot.slane %v1382_v11, 4  ;;  %v1339_v13 = vrot.slane %v1338_v0, 4 }
 0x70f   : > { %v1384_v14 = vadd.s32 %v1383_v12, %v1382_v11  ;;  %v1340_v15 = vadd.f32 %v1339_v13, %v1338_v0 }
 0x711   : > { %v1341_v16 = vrot.slane %v1340_v15, 2  ;;  %v1385_v17 = vrot.slane %v1384_v14, 2 }
 0x713   : > { %v1342_v18 = vadd.f32 %v1341_v16, %v1340_v15  ;;  %v1386_v19 = vadd.s32 %v1385_v17, %v1384_v14 }
 0x715   : > { %v1343_v20 = vrot.slane %v1342_v18, 1  ;;  %v1387_v21 = vrot.slane %v1386_v19, 1 }
 0x717   : > { %v1344_v22 = vadd.f32 %v1343_v20, %v1342_v18  ;;  %v1388_v23 = vadd.s32 %v1387_v21, %v1386_v19 }
 0x719   : > { %1657 = vpush %v1344_v22 }
 0x71a   : > { %1659 = vpush %v1388_v23 }
 0x74a   : > { %s1658_s17 = spop %1657 }
 0x74b   : > { %s1348_s24 = smul.f32 0.125, %s1658_s17  ;;  %s1660_s16 = spop %1659 }
 0x74c   : > { %1391 = sst [smem:[#allocation9]] %s1660_s16 }
 0x74d   : > { %1350 = sst [smem:[#allocation10]] %s1348_s24 }
 0x74e PF: > { %p1691_p1 = scmp.eq.s32.totalorder %s2167_s29, 4  ;;  %s2028_s23 = smov [#allocation9]  }
 0x74f   : > { %s2029_s19 = smov [#allocation10]  }
 0x750   : > { %1670 = dma.smem_to_hbm (%p1691_p1), %s2028_s23, 16, %s2472_s10, [#allocation5]  }
 0x751   : > { %1672 = dma.smem_to_hbm (%p1691_p1), %s2029_s19, 16, %s2473_s11, [#allocation11]  }
 0x752   : > { %1987 = dma.done.wait (%p1691_p1), [#allocation5], 16  }
 0x753   : > { %1989 = vsyncadd (%p1691_p1), [#allocation5], 4294967280 }
 0x754   : > { %1991 = dma.done.wait (%p1691_p1), [#allocation11], 16  }
 0x755   : > { %1993 = vsyncadd (%p1691_p1), [#allocation11], 4294967280 }
 0x756   : > { %1418 = sfence }
 0x757 PF: > { %s2492_s20 = sld [smem:[#allocation17_spill]]  ;;  %s2495_s17 = smov %s2000_s18 }
 0x758   : > { %s2493_s15 = sld [smem:[#allocation16_spill]] }
 0x759   : > { %s2494_s19 = sld [smem:[#allocation18_spill]] }
 0x75d   : > { %p25_p10 = scmp.ge.s32.totalorder %s2492_s20, 7  }
 0x75e   : > { %s2496_s18 = smov %s2493_s15 }
 0x75f   :  { %27 = sbr.rel (!%p25_p10) target bundleno = 8 (0x8), region = 131 }
 0x764   :  { %1424 = vsyncpa [#allocation4], 1 }
 0x765   :  { %1426 = vsyncpa [#allocation4 + $0x1], 1 }
 0x766   :  { %1427 = vsyncpa [#allocation7], 1 }
 0x767   :  { %1429 = vsyncpa [#allocation7 + $0x1], 1 }
 0x768   :  { %1430 = vsyncpa [#allocation5], 1 }
 0x769   :  { %1432 = vsyncpa [#allocation5 + $0x1], 1 }
 0x76a   :  { %1433 = vsyncpa [#allocation11], 1 }

</bundles_post_ra>
